<compile_context>
chip_gen: v6e
topology: v6e:2x2x1
jax: 0.10.0
libtpu: 0.0.40
codegen_flags: <defaults>
</compile_context>

<pallas_src>
import jax
import jax.numpy as jnp
from jax.experimental import pallas as pl
from jax.experimental.pallas import tpu as pltpu


# ----------------------------- small, deterministic shapes -------------------
BATCH = 8              # fills all 8 sublanes of a vreg
INPUT_SIZE = 9         # Statlog(Shuttle)-style feature count
N_NEURONS = 50
OUT_PAD = 128          # fc10 output padded 1 -> 128 lanes for a lane-dense store


def mlp_shuttle_kernel(x_ref, w1_ref, w2_ref, w10_ref, b_ref, out_ref):
    """x:(B,I)  w1:(I,N)  w2:(N,N)  w10:(N,OUT_PAD)  b:(1, N+N+OUT_PAD)  out:(B,OUT_PAD)."""
    x = x_ref[...]

    # fc1 -> relu
    h = jnp.dot(x, w1_ref[...], preferred_element_type=jnp.float32)
    h = jnp.maximum(h + b_ref[:, 0:N_NEURONS], 0.0)

    # fc2 -> relu
    h = jnp.dot(h, w2_ref[...], preferred_element_type=jnp.float32)
    h = jnp.maximum(h + b_ref[:, N_NEURONS:2 * N_NEURONS], 0.0)

    # fc10 (zero-padded to OUT_PAD lanes) -> sigmoid
    logits = jnp.dot(h, w10_ref[...], preferred_element_type=jnp.float32)
    logits = logits + b_ref[:, 2 * N_NEURONS:2 * N_NEURONS + OUT_PAD]
    out_ref[...] = jax.nn.sigmoid(logits).astype(out_ref.dtype)


def make_params(key):
    """Deterministic synthetic parameters in PyTorch layout: W (out, in), b (out,)."""
    ks = jax.random.split(key, 6)
    s = 0.1
    p = {
        "w1": jax.random.normal(ks[0], (N_NEURONS, INPUT_SIZE)) * s,
        "b1": jax.random.normal(ks[1], (N_NEURONS,)) * s,
        "w2": jax.random.normal(ks[2], (N_NEURONS, N_NEURONS)) * s,
        "b2": jax.random.normal(ks[3], (N_NEURONS,)) * s,
        "w10": jax.random.normal(ks[4], (1, N_NEURONS)) * s,
        "b10": jax.random.normal(ks[5], (1,)) * s,
    }
    return jax.tree.map(lambda a: a.astype(jnp.float32), p)


def pack_params(p):
    """One-time host-side packing: pre-transpose weights, pad fc10, fuse biases."""
    w1t = p["w1"].T                                   # (I, N)
    w2t = p["w2"].T                                   # (N, N)
    w10t = jnp.zeros((N_NEURONS, OUT_PAD), jnp.float32).at[:, 0:1].set(p["w10"].T)
    b10p = jnp.zeros((OUT_PAD,), jnp.float32).at[0:1].set(p["b10"])
    bias = jnp.concatenate([p["b1"], p["b2"], b10p])[None, :]   # (1, 2N + OUT_PAD)
    return {"w1t": w1t, "w2t": w2t, "w10t": w10t, "bias": bias}


@jax.jit
def mlp_shuttle_forward(x, packed):
    vmem = pl.BlockSpec(memory_space=pltpu.MemorySpace.VMEM)
    flops = 2 * BATCH * (INPUT_SIZE * N_NEURONS + N_NEURONS * N_NEURONS
                         + N_NEURONS * OUT_PAD)
    bytes_accessed = 4 * (BATCH * INPUT_SIZE
                          + INPUT_SIZE * N_NEURONS + N_NEURONS * N_NEURONS
                          + N_NEURONS * OUT_PAD + (2 * N_NEURONS + OUT_PAD)
                          + BATCH * OUT_PAD)
    out_padded = pl.pallas_call(
        mlp_shuttle_kernel,
        out_shape=jax.ShapeDtypeStruct((BATCH, OUT_PAD), jnp.float32),
        in_specs=[vmem] * 5,
        out_specs=vmem,
        cost_estimate=pl.CostEstimate(
            flops=flops,
            transcendentals=BATCH * OUT_PAD,
            bytes_accessed=bytes_accessed,
        ),
    )(x, packed["w1t"], packed["w2t"], packed["w10t"], packed["bias"])
    return out_padded[:, :1]                          # (B, 1) like the PyTorch module


def mlp_shuttle_reference(x, p):
    """Pure-JAX reference mirroring the PyTorch forward."""
    h = jnp.maximum(x @ p["w1"].T + p["b1"], 0.0)
    h = jnp.maximum(h @ p["w2"].T + p["b2"], 0.0)
    return jax.nn.sigmoid(h @ p["w10"].T + p["b10"])


if __name__ == "__main__":
    key = jax.random.PRNGKey(0)
    k_param, k_x = jax.random.split(key)

    params = make_params(k_param)
    packed = pack_params(params)
    x = jax.random.normal(k_x, (BATCH, INPUT_SIZE), dtype=jnp.float32)

    y = mlp_shuttle_forward(x, packed)
    jax.block_until_ready(y)

    y_ref = mlp_shuttle_reference(x, params)
    assert y.shape == (BATCH, 1)
    assert jnp.allclose(y, y_ref, atol=1e-5, rtol=1e-5)

    print("KERNEL_OK")
</pallas_src>

<mosaic_0001>
module attributes {stable_mosaic.version = 11 : i64} {
  func.func @mlp_shuttle_kernel(%arg0: memref<8x9xf32, #tpu.memory_space<vmem>>, %arg1: memref<9x50xf32, #tpu.memory_space<vmem>>, %arg2: memref<50x50xf32, #tpu.memory_space<vmem>>, %arg3: memref<50x128xf32, #tpu.memory_space<vmem>>, %arg4: memref<1x228xf32, #tpu.memory_space<vmem>>, %arg5: memref<8x128xf32, #tpu.memory_space<vmem>>) attributes {dimension_semantics = [], scalar_prefetch = 0 : i64, scratch_operands = 0 : i64, tpu.core_type = #tpu.core_type<tc>} {
    %c0 = arith.constant 0 : index
    %c0_0 = arith.constant 0 : index
    %0 = vector.load %arg0[%c0, %c0_0] : memref<8x9xf32, #tpu.memory_space<vmem>>, vector<8x9xf32>
    %c0_1 = arith.constant 0 : index
    %c0_2 = arith.constant 0 : index
    %1 = vector.load %arg1[%c0_1, %c0_2] : memref<9x50xf32, #tpu.memory_space<vmem>>, vector<9x50xf32>
    %cst = arith.constant dense<0.000000e+00> : vector<8x50xf32>
    %2 = tpu.matmul %0, %1, %cst {dimension_numbers = #tpu.dot_dimension_numbers<[1], [0], [0], [1], [0, 0, 1, 1], [], []>} : vector<8x9xf32>, vector<9x50xf32>, vector<8x50xf32> -> vector<8x50xf32>
    %c0_3 = arith.constant 0 : index
    %c0_4 = arith.constant 0 : index
    %3 = vector.load %arg4[%c0_3, %c0_4] : memref<1x228xf32, #tpu.memory_space<vmem>>, vector<1x50xf32>
    %4 = vector.broadcast %3 : vector<1x50xf32> to vector<8x50xf32>
    %5 = arith.addf %2, %4 : vector<8x50xf32>
    %cst_5 = arith.constant 0.000000e+00 : f32
    %6 = vector.broadcast %cst_5 : f32 to vector<8x50xf32>
    %7 = arith.maximumf %5, %6 : vector<8x50xf32>
    %c0_6 = arith.constant 0 : index
    %c0_7 = arith.constant 0 : index
    %8 = vector.load %arg2[%c0_6, %c0_7] : memref<50x50xf32, #tpu.memory_space<vmem>>, vector<50x50xf32>
    %cst_8 = arith.constant dense<0.000000e+00> : vector<8x50xf32>
    %9 = tpu.matmul %7, %8, %cst_8 {dimension_numbers = #tpu.dot_dimension_numbers<[1], [0], [0], [1], [0, 0, 1, 1], [], []>} : vector<8x50xf32>, vector<50x50xf32>, vector<8x50xf32> -> vector<8x50xf32>
    %c0_9 = arith.constant 0 : index
    %c50 = arith.constant 50 : index
    %10 = vector.load %arg4[%c0_9, %c50] : memref<1x228xf32, #tpu.memory_space<vmem>>, vector<1x50xf32>
    %11 = vector.broadcast %10 : vector<1x50xf32> to vector<8x50xf32>
    %12 = arith.addf %9, %11 : vector<8x50xf32>
    %cst_10 = arith.constant 0.000000e+00 : f32
    %13 = vector.broadcast %cst_10 : f32 to vector<8x50xf32>
    %14 = arith.maximumf %12, %13 : vector<8x50xf32>
    %c0_11 = arith.constant 0 : index
    %c0_12 = arith.constant 0 : index
    %15 = vector.load %arg3[%c0_11, %c0_12] : memref<50x128xf32, #tpu.memory_space<vmem>>, vector<50x128xf32>
    %cst_13 = arith.constant dense<0.000000e+00> : vector<8x128xf32>
    %16 = tpu.matmul %14, %15, %cst_13 {dimension_numbers = #tpu.dot_dimension_numbers<[1], [0], [0], [1], [0, 0, 1, 1], [], []>} : vector<8x50xf32>, vector<50x128xf32>, vector<8x128xf32> -> vector<8x128xf32>
    %c0_14 = arith.constant 0 : index
    %c100 = arith.constant 100 : index
    %17 = vector.load %arg4[%c0_14, %c100] : memref<1x228xf32, #tpu.memory_space<vmem>>, vector<1x128xf32>
    %18 = vector.broadcast %17 : vector<1x128xf32> to vector<8x128xf32>
    %19 = arith.addf %16, %18 : vector<8x128xf32>
    %20 = arith.negf %19 : vector<8x128xf32>
    %21 = math.exp %20 : vector<8x128xf32>
    %cst_15 = arith.constant 1.000000e+00 : f32
    %22 = vector.broadcast %cst_15 : f32 to vector<8x128xf32>
    %23 = arith.addf %22, %21 : vector<8x128xf32>
    %24 = arith.divf %22, %23 : vector<8x128xf32>
    %c0_16 = arith.constant 0 : index
    %c0_17 = arith.constant 0 : index
    %25 = vector.load %arg5[%c0_16, %c0_17] : memref<8x128xf32, #tpu.memory_space<vmem>>, vector<8x128xf32>
    tpu.vector_store %arg5[%c0_16, %c0_17], %24 {strides = array<i32>} : memref<8x128xf32, #tpu.memory_space<vmem>>, vector<8x128xf32>,
    return
  }
}

</mosaic_0001>

<bundles_post_ra>
// kernel: mlp_shuttle_forward.1
= control target key start
LH: loop header
LB: loop body
LE: loop exit
PB: predicated region body
PF: predicated region fallthrough
CT: control target
= control target key end

     0   :  { %10 = vsyncpa [#allocation3], 0  ;;  %s659_s0 = inlined_call_operand.hbm [shape: f32[8,9], index: 0, kind: input, shape index: {}]   ;;  %s660_s1 = inlined_call_operand.hbm [shape: f32[9,50], index: 1, kind: input, shape index: {}]   ;;  %s661_s2 = inlined_call_operand.hbm [shape: f32[50,50], index: 2, kind: input, shape index: {}]   ;;  %s662_s3 = inlined_call_operand.hbm [shape: f32[50,128], index: 3, kind: input, shape index: {}]   ;;  %s663_s4 = inlined_call_operand.hbm [shape: f32[1,228], index: 4, kind: input, shape index: {}]   ;;  %s664_s5 = inlined_call_operand.vmem [shape: f32[8,128], index: 5, kind: output, shape index: {}]  }
   0x1   :  { %11 = vsyncpa [#allocation5], 0 }
   0x2   :  { %12 = vsyncpa [#allocation8], 0  ;;  %s565_s18 = smov [#allocation4]  }
   0x3   :  { %s28_s19 = sshll.u32 %s565_s18, 4  ;;  %s29_s19 = int_to_ptr.vmem [resolvable:$true] %s28_s19 }
   0x4   :  { %s467_s20 = scalar_lea.vmem %s29_s19, 256  ;;  %p472_p1 = scmp.lt.s32.totalorder %s29_s19, %s29_s19 }
   0x5   :  { %p468_p0 = scmp.ne.s32.totalorder %s29_s19, %s467_s20  ;;  %p473_p2 = scmp.lt.s32.totalorder %s467_s20, %s467_s20 }
   0x7   :  { %p474_p3 = por %p473_p2, %p472_p1 }
   0x9   :  { %p475_p4 = pnand %p474_p3, %p468_p0 }
   0xb   :  { %478 = shalt.err (!%p475_p4)
}
   0xc   :  { %s566_s21 = smov 128   ;;  %s567_s22 = smov 8  }
   0xd   :  { %34 = dma.hbm_to_vmem [thread:$0]  %s660_s1, 256, %s29_s19, [#allocation5], %s566_s21, %s566_s21, %s567_s22  }
   0xe   :  { %s568_s25 = smov [#allocation7]   ;;  %s569_s27 = smov [#allocation2]  }
   0xf   :  { %s52_s26 = sshll.u32 %s568_s25, 4  ;;  %s19_s28 = sshll.u32 %s569_s27, 4  ;;  %s53_s26 = int_to_ptr.vmem [resolvable:$true] %s52_s26  ;;  %s20_s28 = int_to_ptr.vmem [resolvable:$true] %s19_s28 }
  0x10   :  { %s487_s29 = scalar_lea.vmem %s53_s26, 896  ;;  %p492_p6 = scmp.lt.s32.totalorder %s53_s26, %s53_s26 }
  0x11   :  { %p488_p5 = scmp.ne.s32.totalorder %s53_s26, %s487_s29  ;;  %p493_p7 = scmp.lt.s32.totalorder %s487_s29, %s487_s29 }
  0x13   :  { %p494_p8 = por %p493_p7, %p492_p6 }
  0x15   :  { %p495_p9 = pnand %p494_p8, %p488_p5 }
  0x17   :  { %498 = shalt.err (!%p495_p9)
}
  0x18   :  { %58 = dma.hbm_to_vmem [thread:$0]  %s662_s3, 896, %s53_s26, [#allocation8], %s566_s21, %s566_s21, %s567_s22  }
  0x19   :  { %s507_s1 = scalar_lea.vmem %s20_s28, 128  ;;  %p512_p11 = scmp.lt.s32.totalorder %s20_s28, %s20_s28 }
  0x1a   :  { %p508_p10 = scmp.ne.s32.totalorder %s20_s28, %s507_s1  ;;  %p513_p12 = scmp.lt.s32.totalorder %s507_s1, %s507_s1 }
  0x1c   :  { %p514_p13 = por %p513_p12, %p512_p11 }
  0x1e   :  { %p515_p0 = pnand %p514_p13, %p508_p10 }
  0x20   :  { %518 = shalt.err (!%p515_p0)
}
  0x21   :  { %22 = dma.hbm_to_vmem [thread:$0]  %s659_s0, 128, %s20_s28, [#allocation3]  }
  0x22   :  { %s570_s9 = smov [#allocation6]   ;;  %s571_s11 = smov [#allocation9]  }
  0x23   :  { %s40_s10 = sshll.u32 %s570_s9, 4  ;;  %s65_s12 = sshll.u32 %s571_s11, 4  ;;  %s41_s10 = int_to_ptr.vmem [resolvable:$true] %s40_s10  ;;  %s66_s12 = int_to_ptr.vmem [resolvable:$true] %s65_s12 }
  0x24   :  { %s527_s13 = scalar_lea.vmem %s41_s10, 896  ;;  %p532_p2 = scmp.lt.s32.totalorder %s41_s10, %s41_s10 }
  0x25   :  { %p528_p1 = scmp.ne.s32.totalorder %s41_s10, %s527_s13  ;;  %p533_p3 = scmp.lt.s32.totalorder %s527_s13, %s527_s13 }
  0x27   :  { %p534_p4 = por %p533_p3, %p532_p2 }
  0x29   :  { %p535_p5 = pnand %p534_p4, %p528_p1 }
  0x2b   :  { %538 = shalt.err (!%p535_p5)
}
  0x2c   :  { %46 = dma.hbm_to_vmem [thread:$0]  %s661_s2, 896, %s41_s10, [#allocation5], %s566_s21, %s566_s21, %s567_s22  }
  0x2d   :  { %s547_s0 = scalar_lea.vmem %s66_s12, 32  ;;  %p552_p7 = scmp.lt.s32.totalorder %s66_s12, %s66_s12 }
  0x2e   :  { %p548_p6 = scmp.ne.s32.totalorder %s66_s12, %s547_s0  ;;  %p553_p8 = scmp.lt.s32.totalorder %s547_s0, %s547_s0 }
  0x30   :  { %p554_p9 = por %p553_p8, %p552_p7 }
  0x32   :  { %p555_p10 = pnand %p554_p9, %p548_p6 }
  0x34   :  { %558 = shalt.err (!%p555_p10)
}
  0x35   :  { %68 = dma.hbm_to_vmem [thread:$0]  %s663_s4, 32, %s66_s12, [#allocation8]  }
  0x36   :  { %559 = dma.done.wait [#allocation3], 128  }
  0x37   :  { %560 = vsyncadd [#allocation3], 4294967168 }
  0x38   :  { %561 = dma.done.wait [#allocation5], 1152  }
  0x39   :  { %562 = vsyncadd [#allocation5], 4294966144 }
  0x3a   :  { %563 = dma.done.wait [#allocation8], 928  }
  0x3b   :  { %564 = vsyncadd [#allocation8], 4294966368  ;;  %v572_v0 = vmov 0.0   ;;  %vm573_vm0 = vmmov 0   ;;  %vm98_vm1 = vcmask 1040384   ;;  %vm187_vm2 = vcmask 1041408  }
  0x3c   :  { %403 = vmatprep.subr.mxu0 %v572_v0  ;;  %407 = vmatprep.mubr.msk.f32.mxu0 %vm573_vm0, %v572_v0  ;;  %v86_v1 = vld [vmem:[#allocation4 + $0x8] sm:$0x1]  ;;  %v85_v2 = vld [vmem:[#allocation4] sm:$0xff]  ;;  %v84_v3 = vld [vmem:[#allocation2] sm:$0xff]  ;;  %vm94_vm3 = vcmask 72704   ;;  %s574_s2 = smov 78   ;;  %v271_v23 = vlaneseq }
  0x3d   :  { %410 = vmatprep.subr.mxu1 %v572_v0  ;;  %424 = vmatprep.mubr.msk.f32.mxu1 %vm573_vm0, %v572_v0  ;;  %v179_v4 = vld [vmem:[#allocation6 + $0x30] sm:$0x3]  ;;  %v178_v5 = vld [vmem:[#allocation6 + $0x28] sm:$0xff]  ;;  %v177_v6 = vld [vmem:[#allocation6 + $0x20] sm:$0xff]  ;;  %vm183_vm4 = vcmask 408576   ;;  %s575_s4 = smov 28  }
  0x3e   :  { %404 = vmatpush3.msk.msra.mxu0 %vm98_vm1, %v86_v1  ;;  %411 = vmatpush3.msk.msra.mxu1 %vm187_vm2, %v179_v4  ;;  %v176_v7 = vld [vmem:[#allocation6 + $0x18] sm:$0xff]  ;;  %v175_v8 = vld [vmem:[#allocation6 + $0x10] sm:$0xff]  ;;  %v174_v9 = vld [vmem:[#allocation6 + $0x8] sm:$0xff]  ;;  %v272_v24 = vshrl.u32 %v271_v23, 7  ;;  %vm283_vm5 = vcmask 228352  }
  0x3f   :  { %405 = vmatprep.subr.mxu0 %v572_v0  ;;  %412 = vmatprep.subr.mxu1 %v572_v0  ;;  %v173_v10 = vld [vmem:[#allocation6] sm:$0xff]  ;;  %v376_v11 = vld [vmem:[#allocation9] ss:$0 sm:$0xff]  ;;  %v268_v12 = vld [vmem:[#allocation7 + $0x30] sm:$0x3] }
  0x40   :  { %406 = vmatpush3.msra.mxu0 %v85_v2  ;;  %413 = vmatpush3.msra.mxu1 %v178_v5  ;;  %v267_v13 = vld [vmem:[#allocation7 + $0x28] sm:$0xff]  ;;  %v266_v14 = vld [vmem:[#allocation7 + $0x20] sm:$0xff]  ;;  %v265_v15 = vld [vmem:[#allocation7 + $0x18] sm:$0xff]  ;;  %v273_v26 = vsub.s32 0, %v272_v24  ;;  %v277_v27 = vsub.s32 1, %v272_v24 }
  0x41   :  { %408 = vmatmul.mubr.msk.f32.vlgmr.msra.gmra.mxu0 %vm94_vm3, %v84_v3  ;;  %414 = vmatprep.subr.mxu1 %v572_v0  ;;  %v264_v20 = vld [vmem:[#allocation7 + $0x10] sm:$0xff]  ;;  %v263_v21 = vld [vmem:[#allocation7 + $0x8] sm:$0xff]  ;;  %v262_v22 = vld [vmem:[#allocation7] sm:$0xff] }
  0x42   :  { %427 = vmatprep.subr.mxu0 %v572_v0  ;;  %415 = vmatpush3.msra.mxu1 %v177_v6  ;;  %v269_v25 = vld [vmem:[#allocation9] sm:$0x3] }
  0x43   :  { %441 = vmatprep.mubr.msk.f32.mxu0 %vm573_vm0, %v572_v0  ;;  %416 = vmatprep.subr.mxu1 %v572_v0  ;;  %v278_v28 = vrot.slane %v269_v25, %v277_v27  ;;  %v274_v29 = vrot.slane %v269_v25, %v273_v26 }
  0x44   :  { %417 = vmatpush3.msra.mxu1 %v176_v7  ;;  %180 = vrot.lane.b32.xlu0 %v376_v11, %s574_s2 }
  0x45   :  { %418 = vmatprep.subr.mxu1 %v572_v0  ;;  %428 = vmatpush3.msk.msra.mxu0 %vm187_vm2, %v268_v12 }
  0x46   :  { %419 = vmatpush3.msra.mxu1 %v175_v8  ;;  %429 = vmatprep.subr.mxu0 %v572_v0 }
  0x47   :  { %420 = vmatprep.subr.mxu1 %v572_v0  ;;  %430 = vmatpush3.msra.mxu0 %v267_v13 }
  0x48   :  { %421 = vmatpush3.msra.mxu1 %v174_v9  ;;  %431 = vmatprep.subr.mxu0 %v572_v0 }
  0x49   :  { %422 = vmatprep.subr.mxu1 %v572_v0  ;;  %432 = vmatpush3.msra.mxu0 %v266_v14 }
  0x4a   :  { %423 = vmatpush3.msra.mxu1 %v173_v10  ;;  %433 = vmatprep.subr.mxu0 %v572_v0 }
  0x4b   :  { %434 = vmatpush3.msra.mxu0 %v265_v15  ;;  %281 = vrot.lane.b32.xlu1 %v278_v28, %s575_s4 }
  0x4c   :  { %435 = vmatprep.subr.mxu0 %v572_v0  ;;  %279 = vrot.lane.b32.xlu0 %v274_v29, %s575_s4 }
  0x4d   :  { %436 = vmatpush3.msra.mxu0 %v264_v20 }
  0x4e   :  { %437 = vmatprep.subr.mxu0 %v572_v0 }
  0x4f   :  { %438 = vmatpush3.msra.mxu0 %v263_v21 }
  0x50   :  { %439 = vmatprep.subr.mxu0 %v572_v0 }
  0x51   :  { %440 = vmatpush3.msra.mxu0 %v262_v22 }
  0xb6   :  { %v181_v30 = vpop.permute.xlu0 %180 }
  0xbd   :  { %v282_v35 = vpop.permute.xlu1 %281 }
  0xbe   :  { %v280_v36 = vpop.permute.xlu0 %279 }
  0xbf   :  { %v284_v37 = vsel %vm283_vm5, %v280_v36, %v282_v35 }
 0x101   :  { %v168_v16 = vpop.f32.mrf.mxu0 }
 0x102   :  { %v169_v17 = vadd.f32 %v376_v11, %v168_v16 }
 0x103   :  { %v409_v18 = vpop.f32.mrf.mxu0 }
 0x104   :  { %v172_v19 = vmax.f32 %v169_v17, 0.0 }
 0x106   :  { %425 = vmatmul.mubr.msk.f32.vlgmr.msra.gmra.mxu1 %vm183_vm4, %v172_v19 }
 0x1c6   :  { %v257_v31 = vpop.f32.mrf.mxu1 }
 0x1c7   :  { %v258_v32 = vadd.f32 %v257_v31, %v181_v30 }
 0x1c8   :  { %v426_v33 = vpop.f32.mrf.mxu1 }
 0x1c9   :  { %v261_v34 = vmax.f32 %v258_v32, 0.0 }
 0x1cb   :  { %442 = vmatmul.mubr.msk.f32.vlgmr.msra.gmra.mxu0 %vm183_vm4, %v261_v34 }
 0x28b   :  { %v358_v38 = vpop.f32.mrf.mxu0 }
 0x28c   :  { %v359_v39 = vadd.f32 %v358_v38, %v284_v37 }
 0x28d   :  { %v443_v40 = vpop.f32.mrf.mxu0 }
 0x28e   :  { %v383_v41 = vmul.f32 -1.442695, %v359_v39 }
 0x290   :  { %455 = vpow2.f32 %v383_v41 }
 0x29d   :  { %v456_v42 = vpop.eup %455 }
 0x29e   :  { %v365_v43 = vadd.f32 1.0, %v456_v42 }
 0x2a0   :  { %457 = vrcp.f32 %v365_v43 }
 0x2ad   :  { %v458_v44 = vpop.eup %457 }
 0x2ae   :  { %368 = vst [vmem:[%s664_s5] sm:$0xff] %v458_v44 }
 0x2af   :  { %373 = vsyncpa [#allocation3], 1 }
 0x2b0   :  { %374 = vsyncpa [#allocation5], 1 }
 0x2b1   :  { %375 = vsyncpa [#allocation8], 1 }

</bundles_post_ra>
